<compile_context>
chip_gen: v5e
topology: v5e:2x2
jax: 0.10.0
libtpu: 0.0.40
codegen_flags: <defaults>
</compile_context>

<pallas_src>
import jax
import jax.numpy as jnp
from jax import lax
from jax.experimental import pallas as pl
from jax.experimental.pallas import tpu as pltpu

_LANES = 128
_SUBLANES = 8            # f32 sublane tile
_NEG_SENTINEL = -1e30    # large finite "minus infinity" for padded logit lanes
_TB_TARGET = 512         # target batch-tile rows (sweep on hardware)


def _round_up(n, m):
    return ((n + m - 1) // m) * m


def _cdiv(a, b):
    return -(-a // b)


def _classifier_kernel(x_ref, w2_ref, b2_ref, w3_ref, b3_ref, o_ref):
    """One batch tile: h = relu(x @ W2t + b2); out = softmax(h @ W3t + b3)."""
    # Cast activations to the weight dtype (no-op for f32; enables the
    # optional bf16-weight variant with f32 accumulation).
    x = x_ref[...].astype(w2_ref.dtype)

    # linear2 + relu.  Weights are stored pre-transposed ([K, N]) so this is a
    # canonical [M,K]x[K,N] MXU matmul (contracting dim on RHS sublanes).
    h = jnp.maximum(
        lax.dot_general(
            x, w2_ref[...],
            dimension_numbers=(((1,), (0,)), ((), ())),
            preferred_element_type=jnp.float32,
        ) + b2_ref[...],
        0.0,
    )

    # linear3 over the lane-padded output dim.  Padded W3 rows/cols are zero
    # and padded b3 lanes carry a large negative sentinel, so padded logits
    # vanish under softmax.
    logits = lax.dot_general(
        h.astype(w3_ref.dtype), w3_ref[...],
        dimension_numbers=(((1,), (0,)), ((), ())),
        preferred_element_type=jnp.float32,
    ) + b3_ref[...]

    # softmax over dim=1 (feature axis); denominator via EUP reciprocal.
    m = jnp.max(logits, axis=1, keepdims=True)
    e = jnp.exp(logits - m)
    denom = jnp.sum(e, axis=1, keepdims=True)
    o_ref[...] = (e * pl.reciprocal(denom, approx=False)).astype(o_ref.dtype)


def prepare_classifier_params(w1, b1, w2, b2, w3, b3, *, weight_dtype=jnp.float32):
    """One-time parameter prep, hoisted out of the hot forward path.

    * linear1 is dead in the reference forward, so its params are dropped.
    * W2/W3 are pre-transposed to [K, N] layout for canonical MXU feeds.
    * in_dim (contracting) and output_size are zero-padded to multiples of
      128 lanes; padded b3 lanes get -1e30 so they drop out of the softmax.
    """
    del w1, b1  # dead in the reference forward — never DMA'd, never computed
    out_size, in_dim = w3.shape
    k_pad = max(_LANES, _round_up(in_dim, _LANES))
    n_pad = max(_LANES, _round_up(out_size, _LANES))

    w2t = (jnp.zeros((k_pad, k_pad), weight_dtype)
           .at[:in_dim, :in_dim].set(w2.T.astype(weight_dtype)))
    b2p = (jnp.zeros((1, k_pad), jnp.float32)
           .at[:, :in_dim].set(jnp.reshape(b2, (1, -1)).astype(jnp.float32)))
    w3t = (jnp.zeros((k_pad, n_pad), weight_dtype)
           .at[:in_dim, :out_size].set(w3.T.astype(weight_dtype)))
    b3p = (jnp.full((1, n_pad), _NEG_SENTINEL, jnp.float32)
           .at[:, :out_size].set(jnp.reshape(b3, (1, -1)).astype(jnp.float32)))

    return dict(w2t=w2t, b2=b2p, w3t=w3t, b3=b3p,
                in_dim=in_dim, out_size=out_size, k_pad=k_pad, n_pad=n_pad)


def linear_classifier_forward(x, params):
    in_dim = params["in_dim"]
    out_size = params["out_size"]
    k_pad = params["k_pad"]
    n_pad = params["n_pad"]
    batch = x.shape[0]

    # --- Batch tiling: near-equal tiles (multiples of 8), target ~512 rows.
    # No shrink-to-divide loop -> awkward batches never collapse to 8-row tiles.
    rows8 = _round_up(max(batch, _SUBLANES), _SUBLANES)
    n_tiles = max(1, _cdiv(rows8, _TB_TARGET))
    # v7x has 2 TensorCores: split mid-size batches into 2 tiles so both cores
    # get work (only when each tile stays reasonably large).
    if n_tiles == 1 and rows8 >= 128:
        n_tiles = 2
    tb = _round_up(_cdiv(rows8, n_tiles), _SUBLANES)
    padded_batch = n_tiles * tb

    # Lane-dense, zero-padded input tile (pad rows/cols contribute nothing).
    xp = jnp.zeros((padded_batch, k_pad), jnp.float32).at[:batch, :in_dim].set(
        x.astype(jnp.float32))

    # --- Scoped-VMEM budget: weights single-buffered, x/out double-buffered.
    w_item = jnp.dtype(params["w2t"].dtype).itemsize
    weight_bytes = (k_pad * k_pad + k_pad * n_pad) * w_item \
        + (k_pad + n_pad) * 4 * _SUBLANES
    io_bytes = 2 * tb * k_pad * 4 + 2 * tb * n_pad * 4
    vmem_limit = min(100 << 20, max(16 << 20, int((weight_bytes + io_bytes) * 1.5)))
    # TODO(synk): for very large in_dim (resident weights > ~VMEM budget on
    # v7x), add a K-tiled "arbitrary" grid axis with a VMEM f32 accumulator.

    grid = (padded_batch // tb,)
    out_padded = pl.pallas_call(
        _classifier_kernel,
        out_shape=jax.ShapeDtypeStruct((padded_batch, n_pad), jnp.float32),
        grid_spec=pltpu.PrefetchScalarGridSpec(
            num_scalar_prefetch=0,
            grid=grid,
            in_specs=[
                # x tile: advances with the grid -> default double-buffering.
                pl.BlockSpec((tb, k_pad), lambda i: (i, 0)),
                # Constant-index weights/biases: resident, single-buffered.
                pl.BlockSpec((k_pad, k_pad), lambda i: (0, 0),
                             pipeline_mode=pl.Buffered(1)),
                pl.BlockSpec((1, k_pad), lambda i: (0, 0),
                             pipeline_mode=pl.Buffered(1)),
                pl.BlockSpec((k_pad, n_pad), lambda i: (0, 0),
                             pipeline_mode=pl.Buffered(1)),
                pl.BlockSpec((1, n_pad), lambda i: (0, 0),
                             pipeline_mode=pl.Buffered(1)),
            ],
            out_specs=pl.BlockSpec((tb, n_pad), lambda i: (i, 0)),
        ),
        compiler_params=pltpu.CompilerParams(
            dimension_semantics=("parallel",),
            vmem_limit_bytes=vmem_limit,
        ),
    )(xp, params["w2t"], params["b2"], params["w3t"], params["b3"])

    return out_padded[:batch, :out_size]


def init_params(key, in_dim, output_size):
    """Deterministic synthetic init (PyTorch Linear shapes: W [out, in], b [1, out])."""
    k1, k2, k3, k4, k5, k6 = jax.random.split(key, 6)
    scale = 1.0 / jnp.sqrt(in_dim)
    w1 = jax.random.uniform(k1, (in_dim, in_dim), jnp.float32, -scale, scale)
    b1 = jax.random.uniform(k2, (1, in_dim), jnp.float32, -scale, scale)
    w2 = jax.random.uniform(k3, (in_dim, in_dim), jnp.float32, -scale, scale)
    b2 = jax.random.uniform(k4, (1, in_dim), jnp.float32, -scale, scale)
    w3 = jax.random.uniform(k5, (output_size, in_dim), jnp.float32, -scale, scale)
    b3 = jax.random.uniform(k6, (1, output_size), jnp.float32, -scale, scale)
    return w1, b1, w2, b2, w3, b3


if __name__ == "__main__":
    batch, in_dim, output_size = 8, 32, 8

    key = jax.random.PRNGKey(0)
    kx, kp = jax.random.split(key)
    x = jax.random.normal(kx, (batch, in_dim), jnp.float32)
    w1, b1, w2, b2, w3, b3 = init_params(kp, in_dim, output_size)

    # One-time prep (transpose + lane padding) hoisted out of the hot path.
    params = prepare_classifier_params(w1, b1, w2, b2, w3, b3)

    out = linear_classifier_forward(x, params)
    out = jax.block_until_ready(out)

    # Pure-JAX reference (same dead-linear1 semantics as the PyTorch module).
    h_ref = jnp.maximum(x @ w2.T + b2, 0.0)
    logits_ref = h_ref @ w3.T + b3
    ref = jax.nn.softmax(logits_ref, axis=1)

    assert out.shape == (batch, output_size)
    assert jnp.allclose(out, ref, atol=1e-5, rtol=1e-5)
    assert jnp.allclose(jnp.sum(out, axis=1), 1.0, atol=1e-5)

    print("KERNEL_OK")
</pallas_src>

<mosaic_0001>
module attributes {stable_mosaic.version = 11 : i64} {
  func.func @_classifier_kernel(%arg0: i32, %arg1: memref<8x128xf32, #tpu.memory_space<vmem>>, %arg2: memref<128x128xf32, #tpu.memory_space<vmem>>, %arg3: memref<1x128xf32, #tpu.memory_space<vmem>>, %arg4: memref<128x128xf32, #tpu.memory_space<vmem>>, %arg5: memref<1x128xf32, #tpu.memory_space<vmem>>, %arg6: memref<8x128xf32, #tpu.memory_space<vmem>>) attributes {dimension_semantics = [#tpu.dimension_semantics<parallel>], iteration_bounds = array<i64: 1>, scalar_prefetch = 0 : i64, scratch_operands = 0 : i64, tpu.core_type = #tpu.core_type<tc>, window_params = [{transform_indices = @transform_0, window_bounds = array<i64: 8, 128>}, {pipeline_mode = #tpu.pipeline_mode<synchronous>, transform_indices = @transform_1, window_bounds = array<i64: 128, 128>}, {pipeline_mode = #tpu.pipeline_mode<synchronous>, transform_indices = @transform_2, window_bounds = array<i64: 1, 128>}, {pipeline_mode = #tpu.pipeline_mode<synchronous>, transform_indices = @transform_3, window_bounds = array<i64: 128, 128>}, {pipeline_mode = #tpu.pipeline_mode<synchronous>, transform_indices = @transform_4, window_bounds = array<i64: 1, 128>}, {transform_indices = @transform_5, window_bounds = array<i64: 8, 128>}]} {
    %c0 = arith.constant 0 : index
    %c0_0 = arith.constant 0 : index
    %0 = vector.load %arg1[%c0, %c0_0] : memref<8x128xf32, #tpu.memory_space<vmem>>, vector<8x128xf32>
    %c0_1 = arith.constant 0 : index
    %c0_2 = arith.constant 0 : index
    %1 = vector.load %arg2[%c0_1, %c0_2] : memref<128x128xf32, #tpu.memory_space<vmem>>, vector<128x128xf32>
    %cst = arith.constant dense<0.000000e+00> : vector<8x128xf32>
    %2 = tpu.matmul %0, %1, %cst {dimension_numbers = #tpu.dot_dimension_numbers<[1], [0], [0], [1], [0, 0, 1, 1], [], []>} : vector<8x128xf32>, vector<128x128xf32>, vector<8x128xf32> -> vector<8x128xf32>
    %c0_3 = arith.constant 0 : index
    %c0_4 = arith.constant 0 : index
    %3 = vector.load %arg3[%c0_3, %c0_4] : memref<1x128xf32, #tpu.memory_space<vmem>>, vector<1x128xf32>
    %4 = vector.broadcast %3 : vector<1x128xf32> to vector<8x128xf32>
    %5 = arith.addf %2, %4 : vector<8x128xf32>
    %cst_5 = arith.constant 0.000000e+00 : f32
    %6 = vector.broadcast %cst_5 : f32 to vector<8x128xf32>
    %7 = arith.maximumf %5, %6 : vector<8x128xf32>
    %c0_6 = arith.constant 0 : index
    %c0_7 = arith.constant 0 : index
    %8 = vector.load %arg4[%c0_6, %c0_7] : memref<128x128xf32, #tpu.memory_space<vmem>>, vector<128x128xf32>
    %cst_8 = arith.constant dense<0.000000e+00> : vector<8x128xf32>
    %9 = tpu.matmul %7, %8, %cst_8 {dimension_numbers = #tpu.dot_dimension_numbers<[1], [0], [0], [1], [0, 0, 1, 1], [], []>} : vector<8x128xf32>, vector<128x128xf32>, vector<8x128xf32> -> vector<8x128xf32>
    %c0_9 = arith.constant 0 : index
    %c0_10 = arith.constant 0 : index
    %10 = vector.load %arg5[%c0_9, %c0_10] : memref<1x128xf32, #tpu.memory_space<vmem>>, vector<1x128xf32>
    %11 = vector.broadcast %10 : vector<1x128xf32> to vector<8x128xf32>
    %12 = arith.addf %9, %11 : vector<8x128xf32>
    %cst_11 = arith.constant dense<0xFF800000> : vector<8xf32>
    %13 = vector.multi_reduction <maximumf>, %12, %cst_11 [1] : vector<8x128xf32> to vector<8xf32>
    %14 = vector.shape_cast %13 : vector<8xf32> to vector<8x1xf32>
    %15 = vector.broadcast %14 : vector<8x1xf32> to vector<8x128xf32>
    %16 = arith.subf %12, %15 : vector<8x128xf32>
    %17 = math.exp %16 : vector<8x128xf32>
    %cst_12 = arith.constant dense<0.000000e+00> : vector<8xf32>
    %18 = vector.multi_reduction <add>, %17, %cst_12 [1] : vector<8x128xf32> to vector<8xf32>
    %19 = vector.shape_cast %18 : vector<8xf32> to vector<8x1xf32>
    %20 = tpu.reciprocal %19 : vector<8x1xf32> -> vector<8x1xf32>
    %21 = vector.broadcast %20 : vector<8x1xf32> to vector<8x128xf32>
    %22 = arith.mulf %17, %21 : vector<8x128xf32>
    %c0_13 = arith.constant 0 : index
    %c0_14 = arith.constant 0 : index
    %23 = vector.load %arg6[%c0_13, %c0_14] : memref<8x128xf32, #tpu.memory_space<vmem>>, vector<8x128xf32>
    tpu.vector_store %arg6[%c0_13, %c0_14], %22 {strides = array<i32>} : memref<8x128xf32, #tpu.memory_space<vmem>>, vector<8x128xf32>,
    return
  }
  func.func @transform_0(%arg0: i32) -> (i32, i32) {
    %c0_i32 = arith.constant 0 : i32
    %c0_i32_0 = arith.constant 0 : i32
    return %arg0, %c0_i32 : i32, i32
  }
  func.func @transform_1(%arg0: i32) -> (i32, i32) {
    %c0_i32 = arith.constant 0 : i32
    %c0_i32_0 = arith.constant 0 : i32
    %c0_i32_1 = arith.constant 0 : i32
    return %c0_i32, %c0_i32_0 : i32, i32
  }
  func.func @transform_2(%arg0: i32) -> (i32, i32) {
    %c0_i32 = arith.constant 0 : i32
    %c0_i32_0 = arith.constant 0 : i32
    %c0_i32_1 = arith.constant 0 : i32
    return %c0_i32, %c0_i32_0 : i32, i32
  }
  func.func @transform_3(%arg0: i32) -> (i32, i32) {
    %c0_i32 = arith.constant 0 : i32
    %c0_i32_0 = arith.constant 0 : i32
    %c0_i32_1 = arith.constant 0 : i32
    return %c0_i32, %c0_i32_0 : i32, i32
  }
  func.func @transform_4(%arg0: i32) -> (i32, i32) {
    %c0_i32 = arith.constant 0 : i32
    %c0_i32_0 = arith.constant 0 : i32
    %c0_i32_1 = arith.constant 0 : i32
    return %c0_i32, %c0_i32_0 : i32, i32
  }
  func.func @transform_5(%arg0: i32) -> (i32, i32) {
    %c0_i32 = arith.constant 0 : i32
    %c0_i32_0 = arith.constant 0 : i32
    return %arg0, %c0_i32 : i32, i32
  }
}

</mosaic_0001>

<bundles_post_ra>
// kernel: tpu_custom_call.1
= control target key start
LH: loop header
LB: loop body
LE: loop exit
PB: predicated region body
PF: predicated region fallthrough
CT: control target
= control target key end

     0   :  { %10 = vsyncpa [#allocation3], 0  ;;  %s357_s0 = inlined_call_operand.hbm [shape: f32[8,128], index: 0, kind: input, shape index: {}]   ;;  %s358_s1 = inlined_call_operand.hbm [shape: f32[128,128], index: 1, kind: input, shape index: {}]   ;;  %s359_s2 = inlined_call_operand.vmem [shape: f32[1,128], index: 2, kind: input, shape index: {}]   ;;  %s360_s3 = inlined_call_operand.hbm [shape: f32[128,128], index: 3, kind: input, shape index: {}]   ;;  %s361_s4 = inlined_call_operand.vmem [shape: f32[1,128], index: 4, kind: input, shape index: {}]   ;;  %s362_s5 = inlined_call_operand.hbm [shape: f32[8,128], index: 5, kind: output, shape index: {}]  }
   0x1   :  { %11 = vsyncpa [#allocation6], 0  ;;  %s28_s20 = sshll.u32 %s358_s1, 4  ;;  %s29_s20 = int_to_ptr.hbm [resolvable:$true] %s28_s20 }
   0x2   :  { %12 = vsyncpa [#allocation4], 0  ;;  %s303_s21 = smov [#allocation5]   ;;  %s18_s25 = sshll.u32 %s357_s0, 4  ;;  %s19_s25 = int_to_ptr.hbm [resolvable:$true] %s18_s25 }
   0x3   :  { %s30_s22 = sshll.u32 %s303_s21, 4  ;;  %s304_s26 = smov 128   ;;  %s31_s22 = int_to_ptr.vmem [resolvable:$true] %s30_s22 }
   0x4   :  { %s305_s27 = smov 8   ;;  %s306_s28 = smov [#allocation2]  }
   0x5   :  { %36 = dma.hbm_to_vmem [thread:$0]  %s29_s20, 2048, %s31_s22, [#allocation6], %s304_s26, %s304_s26, %s305_s27  }
   0x6   :  { %s20_s29 = sshll.u32 %s306_s28, 4  ;;  %s43_s7 = sshll.u32 %s360_s3, 4  ;;  %s21_s29 = int_to_ptr.vmem [resolvable:$true] %s20_s29  ;;  %s44_s7 = int_to_ptr.hbm [resolvable:$true] %s43_s7 }
   0x7   :  { %23 = dma.hbm_to_vmem [thread:$0]  %s19_s25, 128, %s21_s29, [#allocation3]  }
   0x8   :  { %s307_s1 = smov [#allocation7]  }
   0x9   :  { %s45_s8 = sshll.u32 %s307_s1, 4  ;;  %s46_s8 = int_to_ptr.vmem [resolvable:$true] %s45_s8 }
   0xa   :  { %51 = dma.hbm_to_vmem [thread:$0]  %s44_s7, 2048, %s46_s8, [#allocation6], %s304_s26, %s304_s26, %s305_s27  }
   0xb   :  { %297 = dma.done.wait [#allocation3], 128  }
   0xc   :  { %298 = vsyncadd [#allocation3], 4294967168 }
   0xd   :  { %299 = dma.done.wait [#allocation6], 4096  }
   0xe   :  { %300 = vsyncadd [#allocation6], 4294963200  ;;  %v82_v0 = vld [vmem:[#allocation5 + $0x78] sm:$0xff]  ;;  %v81_v1 = vld [vmem:[#allocation5 + $0x70] sm:$0xff]  ;;  %s178_s13 = sshll.u32 %s362_s5, 4  ;;  %s179_s13 = int_to_ptr.hbm [resolvable:$true] %s178_s13 }
   0xf   :  { %87 = vmatpush.msra.mxu0 %v82_v0  ;;  %v80_v2 = vld [vmem:[#allocation5 + $0x68] sm:$0xff]  ;;  %v79_v3 = vld [vmem:[#allocation5 + $0x60] sm:$0xff]  ;;  %v123_v4 = vld [vmem:[#allocation7 + $0x78] sm:$0xff] }
  0x10   :  { %v78_v5 = vld [vmem:[#allocation5 + $0x58] sm:$0xff]  ;;  %128 = vmatpush.msra.mxu1 %v123_v4  ;;  %v122_v6 = vld [vmem:[#allocation7 + $0x70] sm:$0xff]  ;;  %v121_v7 = vld [vmem:[#allocation7 + $0x68] sm:$0xff] }
  0x11   :  { %88 = vmatpush.msra.mxu0 %v81_v1  ;;  %v77_v8 = vld [vmem:[#allocation5 + $0x50] sm:$0xff]  ;;  %v120_v9 = vld [vmem:[#allocation7 + $0x60] sm:$0xff]  ;;  %v76_v10 = vld [vmem:[#allocation5 + $0x48] sm:$0xff] }
  0x12   :  { %129 = vmatpush.msra.mxu1 %v122_v6  ;;  %v119_v11 = vld [vmem:[#allocation7 + $0x58] sm:$0xff]  ;;  %v75_v12 = vld [vmem:[#allocation5 + $0x40] sm:$0xff]  ;;  %v118_v13 = vld [vmem:[#allocation7 + $0x50] sm:$0xff] }
  0x13   :  { %89 = vmatpush.msra.mxu0 %v80_v2  ;;  %v74_v14 = vld [vmem:[#allocation5 + $0x38] sm:$0xff]  ;;  %v117_v15 = vld [vmem:[#allocation7 + $0x48] sm:$0xff]  ;;  %v73_v16 = vld [vmem:[#allocation5 + $0x30] sm:$0xff] }
  0x14   :  { %130 = vmatpush.msra.mxu1 %v121_v7  ;;  %v116_v17 = vld [vmem:[#allocation7 + $0x40] sm:$0xff]  ;;  %v72_v18 = vld [vmem:[#allocation5 + $0x28] sm:$0xff]  ;;  %v115_v19 = vld [vmem:[#allocation7 + $0x38] sm:$0xff] }
  0x15   :  { %90 = vmatpush.msra.mxu0 %v79_v3  ;;  %v71_v20 = vld [vmem:[#allocation5 + $0x20] sm:$0xff]  ;;  %v114_v21 = vld [vmem:[#allocation7 + $0x30] sm:$0xff]  ;;  %v70_v22 = vld [vmem:[#allocation5 + $0x18] sm:$0xff] }
  0x16   :  { %131 = vmatpush.msra.mxu1 %v120_v9  ;;  %v113_v23 = vld [vmem:[#allocation7 + $0x28] sm:$0xff]  ;;  %v69_v24 = vld [vmem:[#allocation5 + $0x10] sm:$0xff]  ;;  %v112_v25 = vld [vmem:[#allocation7 + $0x20] sm:$0xff] }
  0x17   :  { %91 = vmatpush.msra.mxu0 %v78_v5  ;;  %v68_v26 = vld [vmem:[#allocation5 + $0x8] sm:$0xff]  ;;  %v111_v27 = vld [vmem:[#allocation7 + $0x18] sm:$0xff]  ;;  %v67_v28 = vld [vmem:[#allocation5] sm:$0xff] }
  0x18   :  { %132 = vmatpush.msra.mxu1 %v119_v11  ;;  %v66_v29 = vld [vmem:[#allocation2] sm:$0xff]  ;;  %v110_v30 = vld [vmem:[#allocation7 + $0x10] sm:$0xff]  ;;  %v109_v31 = vld [vmem:[#allocation7 + $0x8] sm:$0xff] }
  0x19   :  { %92 = vmatpush.msra.mxu0 %v77_v8  ;;  %v108_v32 = vld [vmem:[#allocation7] sm:$0xff]  ;;  %v195_v33 = vld [vmem:[%s359_s2] ss:$0 sm:$0xff]  ;;  %s308_s2 = smov [#allocation8]  }
  0x1a   :  { %133 = vmatpush.msra.mxu1 %v118_v13  ;;  %v196_v37 = vld [vmem:[%s361_s4] ss:$0 sm:$0xff]  ;;  %s176_s4 = sshll.u32 %s308_s2, 4  ;;  %s177_s4 = int_to_ptr.vmem [resolvable:$true] %s176_s4 }
  0x1b   :  { %93 = vmatpush.msra.mxu0 %v76_v10 }
  0x1c   :  { %134 = vmatpush.msra.mxu1 %v117_v15 }
  0x1d   :  { %94 = vmatpush.msra.mxu0 %v75_v12 }
  0x1e   :  { %135 = vmatpush.msra.mxu1 %v116_v17 }
  0x1f   :  { %95 = vmatpush.msra.mxu0 %v74_v14 }
  0x20   :  { %136 = vmatpush.msra.mxu1 %v115_v19 }
  0x21   :  { %96 = vmatpush.msra.mxu0 %v73_v16 }
  0x22   :  { %137 = vmatpush.msra.mxu1 %v114_v21 }
  0x23   :  { %97 = vmatpush.msra.mxu0 %v72_v18 }
  0x24   :  { %138 = vmatpush.msra.mxu1 %v113_v23 }
  0x25   :  { %98 = vmatpush.msra.mxu0 %v71_v20 }
  0x26   :  { %139 = vmatpush.msra.mxu1 %v112_v25 }
  0x27   :  { %99 = vmatpush.msra.mxu0 %v70_v22 }
  0x28   :  { %140 = vmatpush.msra.mxu1 %v111_v27 }
  0x29   :  { %100 = vmatpush.msra.mxu0 %v69_v24 }
  0x2a   :  { %141 = vmatpush.msra.mxu1 %v110_v30 }
  0x2b   :  { %101 = vmatpush.msra.mxu0 %v68_v26 }
  0x2c   :  { %142 = vmatpush.msra.mxu1 %v109_v31 }
  0x2d   :  { %102 = vmatpush.msra.mxu0 %v67_v28 }
  0x2e   :  { %103 = vmatmul.f32.vlgmr.msra.gmra.mxu0 %v66_v29  ;;  %143 = vmatpush.msra.mxu1 %v108_v32 }
  0xab   :  { %v104_v34 = vpop.f32.mrf.mxu0 }
  0xac   :  { %v105_v35 = vadd.f32 %v195_v33, %v104_v34 }
  0xae   :  { %v107_v36 = vmax.f32 %v105_v35, 0.0 }
  0xb0   :  { %144 = vmatmul.f32.vlgmr.msra.gmra.mxu1 %v107_v36 }
 0x12d   :  { %v145_v38 = vpop.f32.mrf.mxu1 }
 0x12e   :  { %v146_v39 = vadd.f32 %v196_v37, %v145_v38 }
 0x130   :  { %148 = vmax.xlane.f32.xlu0 %v146_v39 }
 0x1a3   :  { %v149_v40 = vpop.xlane.xlu0 %148 }
 0x1a4   :  { %v150_v41 = vsub.f32 %v146_v39, %v149_v40 }
 0x1a6   :  { %v151_v42 = vmul.f32 1.442695, %v150_v41 }
 0x1a8   :  { %197 = vpow2.f32 %v151_v42 }
 0x1ae   :  { %v198_v43 = vpop.eup %197 }
 0x1af   :  { %153 = vadd.xlane.f32.xlu0 %v198_v43 }
 0x222   :  { %v154_v44 = vpop.xlane.xlu0 %153 }
 0x223   :  { %199 = vrcp.f32 %v154_v44  ;;  %v166_v48 = vand.u32 2147483648, %v154_v44  ;;  %v164_v50 = vand.u32 2147483647, %v154_v44  ;;  %vm160_vm1 = vweird.f32 %v154_v44 }
 0x225   :  { %v167_v52 = vor.u32 1.1754944e-38, %v166_v48  ;;  %vm165_vm3 = vcmp.eq.f32.partialorder %v164_v50, 8.507059e+37 }
 0x229   :  { %v200_v45 = vpop.eup %199 }
 0x22a   :  { %v156_v46 = vmul.f32 %v200_v45, %v154_v44  ;;  %vm161_vm0 = vweird.f32 %v200_v45 }
 0x22b   :  { %vm162_vm2 = vmor %vm160_vm1, %vm161_vm0 }
 0x22c   :  { %v157_v47 = vsub.f32 1.0, %v156_v46 }
 0x22e   :  { %v158_v49 = vmul.f32 %v200_v45, %v157_v47 }
 0x230   :  { %v159_v51 = vadd.f32 %v200_v45, %v158_v49 }
 0x232   :  { %v163_v53 = vsel %vm162_vm2, %v200_v45, %v159_v51 }
 0x233   :  { %v168_v54 = vsel %vm165_vm3, %v167_v52, %v163_v53 }
 0x234   :  { %v169_v55 = vmul.f32 %v198_v43, %v168_v54 }
 0x236   :  { %170 = vst [vmem:[#allocation8] sm:$0xff] %v169_v55 }
 0x237   :  { %181 = dma.vmem_to_hbm [thread:$0]  %s177_s4, 128, %s179_s13, [#allocation4]  }
 0x238   :  { %301 = dma.done.wait [#allocation4], 128  }
 0x239   :  { %302 = vsyncadd [#allocation4], 4294967168 }
 0x23a   :  { %186 = vsyncpa [#allocation3], 1 }
 0x23b   :  { %187 = vsyncpa [#allocation6], 1 }
 0x23c   :  { %188 = vsyncpa [#allocation4], 1 }

</bundles_post_ra>
